<compile_context>
chip_gen: v5e
topology: v5e:2x2
jax: 0.10.0
libtpu: 0.0.40
codegen_flags: <defaults>
</compile_context>

<pallas_src>
import jax
import jax.numpy as jnp
from jax.experimental import pallas as pl
from jax.experimental.pallas import tpu as pltpu

FEAT = 128        # shared_feat / bbox_feat / shape_feat are all hard-coded 128
FUSED = 2 * FEAT  # both branches fused along the feature (lane) axis


def _round_up(x, m):
    return pl.cdiv(x, m) * m


def _latent_encoder_kernel(x_ref, w1_ref, b1_ref, w2_ref, b2_ref,
                           box_ref, shape_ref):
    """Fused two-branch MLP over a (tile_m, 128) tile of latent rows.

    x_ref  : (tile_m, 128) bf16
    w1_ref : (128, 256) bf16  = concat([W1_box, W1_shape], axis=1)
    b1_ref : (1, 256)   f32   = concat([b1_box, b1_shape], axis=1)
    w2_ref : (256, 256) bf16  = block_diag(W2_box, W2_shape)
    b2_ref : (1, 256)   f32   = concat([b2_box, b2_shape], axis=1)
    box_ref, shape_ref : (tile_m, 128) f32 outputs
    """
    x = x_ref[...]
    # Layer 1, both branches at once: (tile_m,128) @ (128,256), f32 accumulate.
    h = jnp.dot(x, w1_ref[...], preferred_element_type=jnp.float32) + b1_ref[...]
    h = jnp.maximum(h, 0.0).astype(w2_ref.dtype)
    # Layer 2: block-diagonal keeps the two branches independent -> (tile_m,256).
    y = jnp.dot(h, w2_ref[...], preferred_element_type=jnp.float32) + b2_ref[...]
    # Two full-lane-width (128) stores, one per output array.
    box_ref[...] = y[:, :FEAT].astype(box_ref.dtype)
    shape_ref[...] = y[:, FEAT:].astype(shape_ref.dtype)


def latent_encoder_forward(params, *, tile_m=4096, min_rows_for_pallas=64):
    """LatentEncoder forward pass.

    params: dict with
      latent_codes: (1, max_len, 128) f32
      w1b, w2b, w1s, w2s: (128, 128) f32   (in, out) layout, i.e. y = x @ W + b
      b1b, b2b, b1s, b2s: (1, 128) f32
    Returns {'box_feat': (1, max_len, 128), 'shape_feat': (1, max_len, 128)} f32.
    """
    latent = params["latent_codes"]
    _, max_len, feat = latent.shape
    assert feat == FEAT

    x = latent.reshape(max_len, FEAT)  # squeeze batch=1 (row-major, free)

    # ---- Tiny problems: pure JAX; kernel launch overhead dominates compute. ----
    if max_len < min_rows_for_pallas:
        def mlp(x, w1, b1, w2, b2):
            return jnp.maximum(x @ w1 + b1, 0.0) @ w2 + b2
        box = mlp(x, params["w1b"], params["b1b"], params["w2b"], params["b2b"])
        shp = mlp(x, params["w1s"], params["b1s"], params["w2s"], params["b2s"])
        return {"box_feat": box.reshape(1, max_len, FEAT),
                "shape_feat": shp.reshape(1, max_len, FEAT)}

    # ---- One-time host-side branch fusion + bf16 cast of MXU operands. ----
    w1 = jnp.concatenate([params["w1b"], params["w1s"]], axis=1).astype(jnp.bfloat16)
    b1 = jnp.concatenate([params["b1b"], params["b1s"]], axis=1).astype(jnp.float32)
    w2 = jnp.zeros((FUSED, FUSED), jnp.float32)
    w2 = w2.at[:FEAT, :FEAT].set(params["w2b"]).at[FEAT:, FEAT:].set(params["w2s"])
    w2 = w2.astype(jnp.bfloat16)
    b2 = jnp.concatenate([params["b2b"], params["b2s"]], axis=1).astype(jnp.float32)

    x_bf = x.astype(jnp.bfloat16)

    # ---- Row tiling: big tiles, multiple of 8, but keep >=2 grid steps. ----
    tile_m = max(8, min(_round_up(int(tile_m), 8),
                        _round_up(pl.cdiv(max_len, 2), 8)))
    padded = _round_up(max_len, tile_m)
    if padded != max_len:
        x_bf = jnp.pad(x_bf, ((0, padded - max_len), (0, 0)))
    grid = (padded // tile_m,)

    row_in_spec = pl.BlockSpec((tile_m, FEAT), lambda i: (i, 0))
    row_out_spec = pl.BlockSpec((tile_m, FEAT), lambda i: (i, 0))
    w1_spec = pl.BlockSpec((FEAT, FUSED), lambda i: (0, 0))   # constant index_map:
    w2_spec = pl.BlockSpec((FUSED, FUSED), lambda i: (0, 0))  # no re-DMA per step
    b_spec = pl.BlockSpec((1, FUSED), lambda i: (0, 0))

    grid_spec = pltpu.PrefetchScalarGridSpec(
        num_scalar_prefetch=0,
        grid=grid,
        in_specs=[row_in_spec, w1_spec, b_spec, w2_spec, b_spec],
        out_specs=[row_out_spec, row_out_spec],
    )

    box, shp = pl.pallas_call(
        _latent_encoder_kernel,
        grid_spec=grid_spec,
        out_shape=(jax.ShapeDtypeStruct((padded, FEAT), jnp.float32),
                   jax.ShapeDtypeStruct((padded, FEAT), jnp.float32)),
        compiler_params=pltpu.CompilerParams(
            dimension_semantics=("parallel",)),
    )(x_bf, w1, b1, w2, b2)

    box = box[:max_len]
    shp = shp[:max_len]
    return {"box_feat": box.reshape(1, max_len, FEAT),
            "shape_feat": shp.reshape(1, max_len, FEAT)}


def init_params(key, max_len):
    """Deterministic synthetic init matching LatentEncoder.__init__ shapes."""
    ks = jax.random.split(key, 9)
    lim = 1.0 / jnp.sqrt(FEAT)  # mimic nn.Linear default uniform bound

    def linear(kw, kb):
        w = jax.random.uniform(kw, (FEAT, FEAT), jnp.float32, -lim, lim)  # (in, out)
        b = jax.random.uniform(kb, (1, FEAT), jnp.float32, -lim, lim)
        return w, b

    latent_codes = jax.random.normal(ks[0], (1, max_len, FEAT), jnp.float32)
    w1b, b1b = linear(ks[1], ks[2])
    w2b, b2b = linear(ks[3], ks[4])
    w1s, b1s = linear(ks[5], ks[6])
    w2s, b2s = linear(ks[7], ks[8])
    return dict(latent_codes=latent_codes,
                w1b=w1b, b1b=b1b, w2b=w2b, b2b=b2b,
                w1s=w1s, b1s=b1s, w2s=w2s, b2s=b2s)


def _reference_forward(params):
    """Pure-JAX f32 reference for correctness check."""
    x = params["latent_codes"]

    def mlp(x, w1, b1, w2, b2):
        return jnp.maximum(x @ w1 + b1, 0.0) @ w2 + b2

    return {
        "box_feat": mlp(x, params["w1b"], params["b1b"], params["w2b"], params["b2b"]),
        "shape_feat": mlp(x, params["w1s"], params["b1s"], params["w2s"], params["b2s"]),
    }


def _check(out, ref, max_len, atol, rtol):
    assert out["box_feat"].shape == (1, max_len, FEAT)
    assert out["shape_feat"].shape == (1, max_len, FEAT)
    assert jnp.allclose(out["box_feat"], ref["box_feat"], atol=atol, rtol=rtol)
    assert jnp.allclose(out["shape_feat"], ref["shape_feat"], atol=atol, rtol=rtol)


if __name__ == "__main__":
    key = jax.random.PRNGKey(0)

    # Case 1: tiny max_len -> pure-JAX fallback path (exact f32).
    p_small = init_params(jax.random.fold_in(key, 0), max_len=12)
    out_small = latent_encoder_forward(p_small)
    jax.block_until_ready(out_small)
    _check(out_small, _reference_forward(p_small), 12, atol=1e-5, rtol=1e-5)

    # Case 2: Pallas path, max_len not a multiple of the tile (padding + 2 steps).
    p_pad = init_params(jax.random.fold_in(key, 1), max_len=203)
    out_pad = latent_encoder_forward(p_pad)
    jax.block_until_ready(out_pad)
    _check(out_pad, _reference_forward(p_pad), 203, atol=5e-2, rtol=5e-2)

    # Case 3: Pallas path, clean multiple (tile clamped to 512, grid of 2).
    p_big = init_params(jax.random.fold_in(key, 2), max_len=1024)
    out_big = latent_encoder_forward(p_big)
    jax.block_until_ready(out_big)
    _check(out_big, _reference_forward(p_big), 1024, atol=5e-2, rtol=5e-2)

    print("KERNEL_OK")
</pallas_src>

<mosaic_0001>
module attributes {stable_mosaic.version = 11 : i64} {
  func.func @_latent_encoder_kernel(%arg0: i32, %arg1: memref<104x128xbf16, #tpu.memory_space<vmem>>, %arg2: memref<128x256xbf16, #tpu.memory_space<vmem>>, %arg3: memref<1x256xf32, #tpu.memory_space<vmem>>, %arg4: memref<256x256xbf16, #tpu.memory_space<vmem>>, %arg5: memref<1x256xf32, #tpu.memory_space<vmem>>, %arg6: memref<104x128xf32, #tpu.memory_space<vmem>>, %arg7: memref<104x128xf32, #tpu.memory_space<vmem>>) attributes {dimension_semantics = [#tpu.dimension_semantics<parallel>], iteration_bounds = array<i64: 2>, scalar_prefetch = 0 : i64, scratch_operands = 0 : i64, tpu.core_type = #tpu.core_type<tc>, window_params = [{transform_indices = @transform_0, window_bounds = array<i64: 104, 128>}, {pipeline_mode = #tpu.pipeline_mode<synchronous>, transform_indices = @transform_1, window_bounds = array<i64: 128, 256>}, {pipeline_mode = #tpu.pipeline_mode<synchronous>, transform_indices = @transform_2, window_bounds = array<i64: 1, 256>}, {pipeline_mode = #tpu.pipeline_mode<synchronous>, transform_indices = @transform_3, window_bounds = array<i64: 256, 256>}, {pipeline_mode = #tpu.pipeline_mode<synchronous>, transform_indices = @transform_4, window_bounds = array<i64: 1, 256>}, {transform_indices = @transform_5, window_bounds = array<i64: 104, 128>}, {transform_indices = @transform_6, window_bounds = array<i64: 104, 128>}]} {
    %c0 = arith.constant 0 : index
    %c0_0 = arith.constant 0 : index
    %0 = vector.load %arg1[%c0, %c0_0] : memref<104x128xbf16, #tpu.memory_space<vmem>>, vector<104x128xbf16>
    %c0_1 = arith.constant 0 : index
    %c0_2 = arith.constant 0 : index
    %1 = vector.load %arg2[%c0_1, %c0_2] : memref<128x256xbf16, #tpu.memory_space<vmem>>, vector<128x256xbf16>
    %cst = arith.constant dense<0.000000e+00> : vector<104x256xf32>
    %2 = tpu.matmul %0, %1, %cst {dimension_numbers = #tpu.dot_dimension_numbers<[1], [0], [0], [1], [0, 0, 1, 1], [], []>} : vector<104x128xbf16>, vector<128x256xbf16>, vector<104x256xf32> -> vector<104x256xf32>
    %c0_3 = arith.constant 0 : index
    %c0_4 = arith.constant 0 : index
    %3 = vector.load %arg3[%c0_3, %c0_4] : memref<1x256xf32, #tpu.memory_space<vmem>>, vector<1x256xf32>
    %4 = vector.broadcast %3 : vector<1x256xf32> to vector<104x256xf32>
    %5 = arith.addf %2, %4 : vector<104x256xf32>
    %cst_5 = arith.constant 0.000000e+00 : f32
    %6 = vector.broadcast %cst_5 : f32 to vector<104x256xf32>
    %7 = arith.maximumf %5, %6 : vector<104x256xf32>
    %8 = arith.truncf %7 : vector<104x256xf32> to vector<104x256xbf16>
    %c0_6 = arith.constant 0 : index
    %c0_7 = arith.constant 0 : index
    %9 = vector.load %arg4[%c0_6, %c0_7] : memref<256x256xbf16, #tpu.memory_space<vmem>>, vector<256x256xbf16>
    %cst_8 = arith.constant dense<0.000000e+00> : vector<104x256xf32>
    %10 = tpu.matmul %8, %9, %cst_8 {dimension_numbers = #tpu.dot_dimension_numbers<[1], [0], [0], [1], [0, 0, 1, 1], [], []>} : vector<104x256xbf16>, vector<256x256xbf16>, vector<104x256xf32> -> vector<104x256xf32>
    %c0_9 = arith.constant 0 : index
    %c0_10 = arith.constant 0 : index
    %11 = vector.load %arg5[%c0_9, %c0_10] : memref<1x256xf32, #tpu.memory_space<vmem>>, vector<1x256xf32>
    %12 = vector.broadcast %11 : vector<1x256xf32> to vector<104x256xf32>
    %13 = arith.addf %10, %12 : vector<104x256xf32>
    %14 = vector.extract_strided_slice %13 {offsets = [0, 0], sizes = [104, 128], strides = [1, 1]} : vector<104x256xf32> to vector<104x128xf32>
    %c0_11 = arith.constant 0 : index
    %c0_12 = arith.constant 0 : index
    %15 = vector.load %arg6[%c0_11, %c0_12] : memref<104x128xf32, #tpu.memory_space<vmem>>, vector<104x128xf32>
    tpu.vector_store %arg6[%c0_11, %c0_12], %14 {strides = array<i32>} : memref<104x128xf32, #tpu.memory_space<vmem>>, vector<104x128xf32>,
    %16 = vector.extract_strided_slice %13 {offsets = [0, 128], sizes = [104, 128], strides = [1, 1]} : vector<104x256xf32> to vector<104x128xf32>
    %c0_13 = arith.constant 0 : index
    %c0_14 = arith.constant 0 : index
    %17 = vector.load %arg7[%c0_13, %c0_14] : memref<104x128xf32, #tpu.memory_space<vmem>>, vector<104x128xf32>
    tpu.vector_store %arg7[%c0_13, %c0_14], %16 {strides = array<i32>} : memref<104x128xf32, #tpu.memory_space<vmem>>, vector<104x128xf32>,
    return
  }
  func.func @transform_0(%arg0: i32) -> (i32, i32) {
    %c0_i32 = arith.constant 0 : i32
    %c0_i32_0 = arith.constant 0 : i32
    return %arg0, %c0_i32 : i32, i32
  }
  func.func @transform_1(%arg0: i32) -> (i32, i32) {
    %c0_i32 = arith.constant 0 : i32
    %c0_i32_0 = arith.constant 0 : i32
    %c0_i32_1 = arith.constant 0 : i32
    return %c0_i32, %c0_i32_0 : i32, i32
  }
  func.func @transform_2(%arg0: i32) -> (i32, i32) {
    %c0_i32 = arith.constant 0 : i32
    %c0_i32_0 = arith.constant 0 : i32
    %c0_i32_1 = arith.constant 0 : i32
    return %c0_i32, %c0_i32_0 : i32, i32
  }
  func.func @transform_3(%arg0: i32) -> (i32, i32) {
    %c0_i32 = arith.constant 0 : i32
    %c0_i32_0 = arith.constant 0 : i32
    %c0_i32_1 = arith.constant 0 : i32
    return %c0_i32, %c0_i32_0 : i32, i32
  }
  func.func @transform_4(%arg0: i32) -> (i32, i32) {
    %c0_i32 = arith.constant 0 : i32
    %c0_i32_0 = arith.constant 0 : i32
    %c0_i32_1 = arith.constant 0 : i32
    return %c0_i32, %c0_i32_0 : i32, i32
  }
  func.func @transform_5(%arg0: i32) -> (i32, i32) {
    %c0_i32 = arith.constant 0 : i32
    %c0_i32_0 = arith.constant 0 : i32
    return %arg0, %c0_i32 : i32, i32
  }
  func.func @transform_6(%arg0: i32) -> (i32, i32) {
    %c0_i32 = arith.constant 0 : i32
    %c0_i32_0 = arith.constant 0 : i32
    return %arg0, %c0_i32 : i32, i32
  }
}

</mosaic_0001>

<bundles_post_ra>
// kernel: tpu_custom_call.1
= control target key start
LH: loop header
LB: loop body
LE: loop exit
PB: predicated region body
PF: predicated region fallthrough
CT: control target
= control target key end

     0   :  { %s2131_s0 = inlined_call_operand.hbm [shape: bf16[208,128], index: 0, kind: input, shape index: {}]   ;;  %s2132_s1 = inlined_call_operand.hbm [shape: bf16[128,256], index: 1, kind: input, shape index: {}]   ;;  %s2133_s2 = inlined_call_operand.hbm [shape: f32[1,256], index: 2, kind: input, shape index: {}]   ;;  %s2134_s3 = inlined_call_operand.hbm [shape: bf16[256,256], index: 3, kind: input, shape index: {}]   ;;  %s2135_s4 = inlined_call_operand.vmem [shape: f32[1,256], index: 4, kind: input, shape index: {}]   ;;  %s2136_s5 = inlined_call_operand.hbm [shape: f32[208,128], index: 5, kind: output, shape index: {0}]   ;;  %s2137_s6 = inlined_call_operand.hbm [shape: f32[208,128], index: 6, kind: output, shape index: {1}]  }
   0x1   :  { %2138 = sst [smem:[#allocation18_spill]] %s2132_s1 }
   0x2   :  { %2139 = sst [smem:[#allocation19_spill]] %s2133_s2 }
   0x3   :  { %12 = vsyncpa [#allocation3], 0 }
   0x4   :  { %14 = vsyncpa [#allocation3 + $0x1], 0 }
   0x5   :  { %15 = vsyncpa [#allocation6], 0 }
   0x6   :  { %16 = vsyncpa [#allocation9], 0 }
   0x7   :  { %17 = vsyncpa [#allocation4], 0 }
   0x8   :  { %19 = vsyncpa [#allocation4 + $0x1], 0 }
   0x9   :  { %20 = vsyncpa [#allocation12], 0 }
   0xa   :  { %22 = vsyncpa [#allocation12 + $0x1], 0  ;;  %s1851_s21 = smov 0   ;;  %s1853_s22 = smov 0  }
   0xb   :  { %s1855_s23 = smov 0   ;;  %s1857_s24 = smov 0  }
   0xc LB: > { %s1872_s25 = sadd.s32 4294967295, %s1805_s24   ;;  %s1184_s26 = sadd.s32 4294967294, %s1805_s24   ;;  %s1805_s24 = sphi %s1857_s24, %s2152_s24   ;;  %s1801_s23 = sphi %s1855_s23, %s2151_s23   ;;  %s1797_s22 = sphi %s1853_s22, %s2150_s22   ;;  %s1793_s21 = sphi %s1851_s21, %s2149_s21  }
   0xd   : > { %p48_p0 = scmp.ne.s32.totalorder %s1797_s22, %s1793_s21  ;;  %p49_p1 = scmp.eq.s32.totalorder %s1872_s25, 0 }
   0xe   : > { %p156_p2 = scmp.eq.s32.totalorder %s1872_s25, 1  ;;  %p162_p3 = scmp.eq.s32.totalorder %s1184_s26, 1 }
   0xf   : > { %p1881_p4 = por %p49_p1, %p48_p0  ;;  %p1185_p5 = scmp.ge.s32.totalorder %s1805_s24, 1 }
  0x10   : > { %p1886_p6 = por %p162_p3, %p48_p0  ;;  %p195_p7 = scmp.lt.s32.totalorder %s1805_s24, 3 }
  0x11   : > { %s2142_s1 = sld [smem:[#allocation18_spill]]  ;;  %s1807_s9 = smov [#allocation5]  }
  0x12   : > { %p1894_p8 = pnand %p1185_p5, %p195_p7  ;;  %s208_s10 = sshll.u32 %s1807_s9, 4  ;;  %s209_s10 = int_to_ptr.vmem [resolvable:$true] %s208_s10 }
  0x13   : > { %s2145_s2 = sld [smem:[#allocation19_spill]]  ;;  %s1808_s15 = smov 128  }
  0x14   : > { %p1509_p9 = pneg %p1894_p8  ;;  %s1809_s16 = smov 8  }
  0x15   : > { %s1810_s17 = smov [#allocation7]   ;;  %s232_s26 = sshll.u32 %s2134_s3, 4  ;;  %s233_s26 = int_to_ptr.hbm [resolvable:$true] %s232_s26 }
  0x16   : > { %p1902_p10 = pnand %p1509_p9, %p49_p1  ;;  %s223_s18 = sshll.u32 %s1810_s17, 4  ;;  %s224_s18 = int_to_ptr.vmem [resolvable:$true] %s223_s18 }
  0x17   : > { %s206_s7 = sshll.u32 %s2142_s1, 4  ;;  %s1811_s29 = smov [#allocation8]   ;;  %s207_s7 = int_to_ptr.hbm [resolvable:$true] %s206_s7 }
  0x18   : > { %1512 = dma.hbm_to_vmem [thread:$0]  (!%p1902_p10), %s207_s7, 2048, %s209_s10, [#allocation6], %s1808_s15, %s1808_s15, %s1809_s16  }
  0x19   : > { %s221_s14 = sshll.u32 %s2145_s2, 4  ;;  %s234_s30 = sshll.u32 %s1811_s29, 4  ;;  %s222_s14 = int_to_ptr.hbm [resolvable:$true] %s221_s14  ;;  %s235_s30 = int_to_ptr.vmem [resolvable:$true] %s234_s30 }
  0x1a   : > { %1515 = dma.hbm_to_vmem [thread:$0]  (!%p1902_p10), %s222_s14, 32, %s224_s18, [#allocation6]  }
  0x1b   : > { %s1918_s7 = sadd.s32 1, %s1805_s24   ;;  %s35_s10 = sadd.s32 1, %s1801_s23 }
  0x1c   : > { %1518 = dma.hbm_to_vmem [thread:$0]  (!%p1902_p10), %s233_s26, 4096, %s235_s30, [#allocation9], %s1808_s15, %s1808_s15, %s1809_s16  }
  0x1d   : > { %s32_s9 = ssub.s32 %s1805_s24, %s1918_s7  ;;  %p42_p13 = scmp.ne.s32.totalorder %s1801_s23, %s1797_s22 }
  0x1e   : > { %p33_p12 = scmp.eq.s32.totalorder %s32_s9, 0  ;;  %p43_p0 = scmp.eq.s32.totalorder %s1805_s24, 0 }
  0x1f   : > { %p1533_p3 = scmp.lt.s32.totalorder %s1805_s24, 2  ;;  %p1934_p7 = por %p156_p2, %p42_p13 }
  0x20   : > { %s1930_s12 = scalar_select %p33_p12, %s1801_s23, %s35_s10  }
  0x21   : > { %p44_p5 = por %p43_p0, %p42_p13  ;;  %s251_s14 = sand.u32 1, %s1801_s23  }
  0x22   : > { %s1415_s17 = smul.u32 52, %s1805_s24  ;;  %s252_s30 = scalar_lea.sflag [#allocation3], %s251_s14 }
  0x23   : > { %s1488_s18 = smul.u32 52, %s251_s14  ;;  %p1943_p9 = pnand %p1533_p3, %p44_p5 }
  0x24   : > { %s260_s15 = scalar_lea.hbm %s2131_s0, %s1415_s17  ;;  %s1676_s19 = scalar_lea.hbm %s2131_s0, 104 }
  0x25   : > { %s261_s20 = sshll.u32 %s260_s15, 4  ;;  %s255_s26 = scalar_lea.vmem [#allocation2], %s1488_s18  ;;  %s262_s20 = int_to_ptr.hbm [resolvable:$true] %s261_s20 }
  0x26   : > { %s263_s29 = sshll.u32 %s255_s26, 4  ;;  %s1669_s9 = sshra.s32 %s262_s20, 4  ;;  %s264_s29 = int_to_ptr.vmem [resolvable:$true] %s263_s29  ;;  %s1670_s9 = int_to_ptr.hbm [resolvable:$true] %s1669_s9 }
  0x27   : > { %s1671_s10 = scalar_lea.hbm %s1670_s9, 52  ;;  %p1673_p10 = pneg %p1943_p9 }
  0x28   : > { %p1672_p2 = scmp.ne.s32.totalorder %s1670_s9, %s1671_s10  ;;  %p1677_p0 = scmp.lt.s32.totalorder %s1670_s9, %s2131_s0 }
  0x29   : > { %p1678_p3 = scmp.lt.s32.totalorder %s1676_s19, %s1671_s10 }
  0x2a   : > { %p1674_p12 = pnand %p1673_p10, %p1672_p2 }
  0x2b   : > { %p1679_p5 = por %p1678_p3, %p1677_p0 }
  0x2c   : > { %p1675_p13 = pneg %p1674_p12 }
  0x2e   : > { %p1680_p11 = pnand %p1679_p5, %p1675_p13 }
  0x30   : > { %1683 = shalt.err (!%p1680_p11)
}
  0x31   : > { %s1812_s14 = smov 64   ;;  %s1813_s18 = smov 4  }
  0x32   : > { %1522 = dma.hbm_to_vmem [thread:$0]  (!%p1943_p9), %s262_s20, 832, %s264_s29, %s252_s30, %s1812_s14, %s1812_s14, %s1813_s18  }
  0x33   : > { %275 = sbr.rel (%p1894_p8) target bundleno = 478 (0x1de), region = 40  ;;  %s1960_s15 = sand.u32 (!%p1894_p8), 1, %s1797_s22  }
  0x34   : > { %s1489_s1 = smul.u32 (!%p1894_p8), 52, %s1960_s15  ;;  %s278_s2 = scalar_lea.sflag (!%p1894_p8), [#allocation3], %s1960_s15 }
  0x36   : > { %s1964_s26 = scalar_lea.vmem (!%p1894_p8), [#allocation2], %s1489_s1 }
  0x38   : > { %1772 = dma.done.wait (%p1881_p4), %s278_s2, 832  }
  0x39   : > { %1774 = vsyncadd (%p1881_p4), %s278_s2, 4294966464 }
  0x3a   : > { %1776 = dma.done.wait (%p49_p1), [#allocation6], 2080  }
  0x3b   : > { %1778 = vsyncadd (%p49_p1), [#allocation6], 4294965216 }
  0x3c   : > { %1780 = dma.done.wait (%p49_p1), [#allocation9], 4096  }
  0x3d   : > { %1782 = vsyncadd (%p49_p1), [#allocation9], 4294963200  ;;  %v1277_v0 = vld [vmem:[#allocation5 + $0x70] sm:$0xf]  ;;  %v1437_v1 = vld [vmem:[#allocation5 + $0x74] sm:$0xf0] }
  0x3e   : > { %v1436_v2 = vld [vmem:[#allocation5 + $0x74] sm:$0xf]  ;;  %v1278_v3 = vor.u32 %v1437_v1, %v1277_v0  ;;  %v1279_v4 = vld [vmem:[#allocation5 + $0x78] sm:$0xf0]  ;;  %v1269_v5 = vld [vmem:[#allocation5 + $0x60] sm:$0xf] }
  0x3f   : > { %v1435_v6 = vld [vmem:[#allocation5 + $0x64] sm:$0xf0]  ;;  %v1282_v7 = vor.u32 %v1436_v2, %v1279_v4  ;;  %v1434_v8 = vld [vmem:[#allocation5 + $0x64] sm:$0xf]  ;;  %v1271_v9 = vld [vmem:[#allocation5 + $0x68] sm:$0xf0] }
  0x40   : > { %489 = vmatpush.bf16.msra.mxu0 %v1278_v3  ;;  %v1270_v10 = vor.u32 %v1435_v6, %v1269_v5  ;;  %1472 = vmatpush.bf16.msra.mxu2 %v1278_v3  ;;  %v1274_v11 = vor.u32 %v1434_v8, %v1271_v9  ;;  %v1261_v12 = vld [vmem:[#allocation5 + $0x50] sm:$0xf]  ;;  %v1433_v13 = vld [vmem:[#allocation5 + $0x54] sm:$0xf0]  ;;  %v1432_v14 = vld [vmem:[#allocation5 + $0x54] sm:$0xf] }
  0x41   : > { %532 = vmatpush.bf16.msra.mxu1 %v1282_v7  ;;  %1480 = vmatpush.bf16.msra.mxu3 %v1282_v7  ;;  %v1263_v15 = vld [vmem:[#allocation5 + $0x58] sm:$0xf0]  ;;  %v1262_v16 = vor.u32 %v1433_v13, %v1261_v12  ;;  %v1253_v18 = vld [vmem:[#allocation5 + $0x40] sm:$0xf]  ;;  %v1431_v19 = vld [vmem:[#allocation5 + $0x44] sm:$0xf0] }
  0x42   : > { %v1266_v17 = vor.u32 %v1432_v14, %v1263_v15  ;;  %v1430_v20 = vld [vmem:[#allocation5 + $0x44] sm:$0xf]  ;;  %v1255_v21 = vld [vmem:[#allocation5 + $0x48] sm:$0xf0]  ;;  %v1254_v22 = vor.u32 %v1431_v19, %v1253_v18  ;;  %v1245_v24 = vld [vmem:[#allocation5 + $0x30] sm:$0xf] }
  0x43   : > { %v1258_v23 = vor.u32 %v1430_v20, %v1255_v21  ;;  %v1429_v25 = vld [vmem:[#allocation5 + $0x34] sm:$0xf0]  ;;  %v1428_v26 = vld [vmem:[#allocation5 + $0x34] sm:$0xf]  ;;  %v1247_v27 = vld [vmem:[#allocation5 + $0x38] sm:$0xf0] }
  0x44   : > { %490 = vmatpush.bf16.msra.mxu0 %v1270_v10  ;;  %1473 = vmatpush.bf16.msra.mxu2 %v1270_v10  ;;  %v1246_v28 = vor.u32 %v1429_v25, %v1245_v24  ;;  %v1250_v29 = vor.u32 %v1428_v26, %v1247_v27  ;;  %v1237_v30 = vld [vmem:[#allocation5 + $0x20] sm:$0xf]  ;;  %v1427_v31 = vld [vmem:[#allocation5 + $0x24] sm:$0xf0]  ;;  %v1426_v32 = vld [vmem:[#allocation5 + $0x24] sm:$0xf] }
  0x45   : > { %533 = vmatpush.bf16.msra.mxu1 %v1274_v11  ;;  %1481 = vmatpush.bf16.msra.mxu3 %v1274_v11  ;;  %v1239_v33 = vld [vmem:[#allocation5 + $0x28] sm:$0xf0]  ;;  %v1238_v34 = vor.u32 %v1427_v31, %v1237_v30  ;;  %v1229_v36 = vld [vmem:[#allocation5 + $0x10] sm:$0xf]  ;;  %v1425_v37 = vld [vmem:[#allocation5 + $0x14] sm:$0xf0] }
  0x46   : > { %v1242_v35 = vor.u32 %v1426_v32, %v1239_v33  ;;  %v1424_v38 = vld [vmem:[#allocation5 + $0x14] sm:$0xf]  ;;  %v1231_v39 = vld [vmem:[#allocation5 + $0x18] sm:$0xf0]  ;;  %v1230_v40 = vor.u32 %v1425_v37, %v1229_v36  ;;  %v1221_v42 = vld [vmem:[#allocation5] sm:$0xf] }
  0x47   : > { %v1234_v41 = vor.u32 %v1424_v38, %v1231_v39  ;;  %v1423_v43 = vld [vmem:[#allocation5 + $0x4] sm:$0xf0]  ;;  %v1422_v44 = vld [vmem:[#allocation5 + $0x4] sm:$0xf]  ;;  %v1223_v45 = vld [vmem:[#allocation5 + $0x8] sm:$0xf0] }
  0x48   : > { %491 = vmatpush.bf16.msra.mxu0 %v1262_v16  ;;  %1474 = vmatpush.bf16.msra.mxu2 %v1262_v16  ;;  %v1222_v46 = vor.u32 %v1423_v43, %v1221_v42  ;;  %v1226_v47 = vor.u32 %v1422_v44, %v1223_v45  ;;  %v1416_v48 = vld [vmem:[%s1964_s26] sm:$0xff]  ;;  %v1417_v49 = vld [vmem:[%s1964_s26 + $0x8] sm:$0xff]  ;;  %v1418_v25 = vld [vmem:[%s1964_s26 + $0x10] sm:$0xff]  ;;  %s1490_s16 = smul.u32 104, %s1960_s15  ;;  %s1719_s9 = scalar_lea.hbm %s2137_s6, 208 }
  0x49   : > { %534 = vmatpush.bf16.msra.mxu1 %v1266_v17  ;;  %1482 = vmatpush.bf16.msra.mxu3 %v1266_v17  ;;  %v1420_v50 = vld [vmem:[%s1964_s26 + $0x20] sm:$0xff]  ;;  %v1450_v57 = vld [vmem:[#allocation8 + $0x64] sm:$0xf]  ;;  %v1333_v5 = vld [vmem:[#allocation8 + $0x60] sm:$0xf]  ;;  %s1470_s30 = smul.u32 104, %s1872_s25 }
  0x4a   : > { %v1452_v51 = vld [vmem:[#allocation8 + $0x74] sm:$0xf]  ;;  %v1343_v52 = vld [vmem:[#allocation8 + $0x78] sm:$0xf0]  ;;  %v1335_v58 = vld [vmem:[#allocation8 + $0x68] sm:$0xf0] }
  0x4b   : > { %v1468_v53 = vld [vmem:[#allocation8 + $0xf4] sm:$0xf]  ;;  %v1407_v54 = vld [vmem:[#allocation8 + $0xf8] sm:$0xf0]  ;;  %v1346_v55 = vor.u32 %v1452_v51, %v1343_v52  ;;  %v1466_v59 = vld [vmem:[#allocation8 + $0xe4] sm:$0xf]  ;;  %v1338_v62 = vor.u32 %v1450_v57, %v1335_v58  ;;  %s1045_s17 = scalar_lea.hbm %s2137_s6, %s1470_s30  ;;  %s2083_s18 = scalar_lea.hbm %s2136_s5, %s1470_s30 }
  0x4c   : > { %492 = vmatpush.bf16.msra.mxu0 %v1254_v22  ;;  %1475 = vmatpush.bf16.msra.mxu2 %v1254_v22  ;;  %v1410_v56 = vor.u32 %v1468_v53, %v1407_v54  ;;  %v1399_v60 = vld [vmem:[#allocation8 + $0xe8] sm:$0xf0]  ;;  %v1341_v61 = vld [vmem:[#allocation8 + $0x70] sm:$0xf]  ;;  %v1453_v0 = vld [vmem:[#allocation8 + $0x74] sm:$0xf0] }
  0x4d   : > { %535 = vmatpush.bf16.msra.mxu1 %v1258_v23  ;;  %1483 = vmatpush.bf16.msra.mxu3 %v1258_v23  ;;  %v1402_v63 = vor.u32 %v1466_v59, %v1399_v60  ;;  %v1405_v1 = vld [vmem:[#allocation8 + $0xf0] sm:$0xf]  ;;  %v1469_v2 = vld [vmem:[#allocation8 + $0xf4] sm:$0xf0]  ;;  %v1342_v3 = vor.u32 %v1453_v0, %v1341_v61  ;;  %v1451_v6 = vld [vmem:[#allocation8 + $0x64] sm:$0xf0] }
  0x4e   : > { %v1406_v4 = vor.u32 %v1469_v2, %v1405_v1  ;;  %v1397_v7 = vld [vmem:[#allocation8 + $0xe0] sm:$0xf]  ;;  %v1467_v8 = vld [vmem:[#allocation8 + $0xe4] sm:$0xf0]  ;;  %v1448_v9 = vld [vmem:[#allocation8 + $0x54] sm:$0xf]  ;;  %v1334_v11 = vor.u32 %v1451_v6, %v1333_v5 }
  0x4f   : > { %v1327_v10 = vld [vmem:[#allocation8 + $0x58] sm:$0xf0]  ;;  %v1398_v12 = vor.u32 %v1467_v8, %v1397_v7  ;;  %v1464_v13 = vld [vmem:[#allocation8 + $0xd4] sm:$0xf]  ;;  %v1325_v17 = vld [vmem:[#allocation8 + $0x50] sm:$0xf] }
  0x50   : > { %493 = vmatpush.bf16.msra.mxu0 %v1246_v28  ;;  %1476 = vmatpush.bf16.msra.mxu2 %v1246_v28  ;;  %v1391_v14 = vld [vmem:[#allocation8 + $0xd8] sm:$0xf0]  ;;  %v1330_v15 = vor.u32 %v1448_v9, %v1327_v10  ;;  %v1449_v18 = vld [vmem:[#allocation8 + $0x54] sm:$0xf0]  ;;  %v1389_v19 = vld [vmem:[#allocation8 + $0xd0] sm:$0xf] }
  0x51   : > { %536 = vmatpush.bf16.msra.mxu1 %v1250_v29  ;;  %1484 = vmatpush.bf16.msra.mxu3 %v1250_v29  ;;  %v1394_v16 = vor.u32 %v1464_v13, %v1391_v14  ;;  %v1465_v20 = vld [vmem:[#allocation8 + $0xd4] sm:$0xf0]  ;;  %v1446_v21 = vld [vmem:[#allocation8 + $0x44] sm:$0xf]  ;;  %v1319_v22 = vld [vmem:[#allocation8 + $0x48] sm:$0xf0]  ;;  %v1326_v26 = vor.u32 %v1449_v18, %v1325_v17 }
  0x52   : > { %v1462_v23 = vld [vmem:[#allocation8 + $0xc4] sm:$0xf]  ;;  %v1383_v24 = vld [vmem:[#allocation8 + $0xc8] sm:$0xf0]  ;;  %v1390_v28 = vor.u32 %v1465_v20, %v1389_v19  ;;  %v1317_v29 = vld [vmem:[#allocation8 + $0x40] sm:$0xf]  ;;  %v1322_v31 = vor.u32 %v1446_v21, %v1319_v22 }
  0x53   : > { %v1421_v27 = vld [vmem:[%s1964_s26 + $0x28] sm:$0xff]  ;;  %v1447_v30 = vld [vmem:[#allocation8 + $0x44] sm:$0xf0]  ;;  %v1386_v32 = vor.u32 %v1462_v23, %v1383_v24  ;;  %v1287_v19 = vld [vmem:[#allocation8 + $0x8] sm:$0xf0]  ;;  %s2024_s20 = scalar_lea.vmem [#allocation11], %s1490_s16 }
  0x54   : > { %494 = vmatpush.bf16.msra.mxu0 %v1238_v34  ;;  %1477 = vmatpush.bf16.msra.mxu2 %v1238_v34  ;;  %v1381_v33 = vld [vmem:[#allocation8 + $0xc0] sm:$0xf]  ;;  %v1463_v34 = vld [vmem:[#allocation8 + $0xc4] sm:$0xf0]  ;;  %v1311_v36 = vld [vmem:[#allocation8 + $0x38] sm:$0xf0]  ;;  %v1318_v39 = vor.u32 %v1447_v30, %v1317_v29 }
  0x55   : > { %537 = vmatpush.bf16.msra.mxu1 %v1242_v35  ;;  %1485 = vmatpush.bf16.msra.mxu3 %v1242_v35  ;;  %v1444_v35 = vld [vmem:[#allocation8 + $0x34] sm:$0xf]  ;;  %v1375_v38 = vld [vmem:[#allocation8 + $0xb8] sm:$0xf0]  ;;  %v1445_v42 = vld [vmem:[#allocation8 + $0x34] sm:$0xf0] }
  0x56   : > { %v1460_v37 = vld [vmem:[#allocation8 + $0xb4] sm:$0xf]  ;;  %v1314_v43 = vor.u32 %v1444_v35, %v1311_v36  ;;  %v1373_v45 = vld [vmem:[#allocation8 + $0xb0] sm:$0xf]  ;;  %v1301_v53 = vld [vmem:[#allocation8 + $0x20] sm:$0xf] }
  0x57   : > { %v1378_v44 = vor.u32 %v1460_v37, %v1375_v38  ;;  %v1443_v54 = vld [vmem:[#allocation8 + $0x24] sm:$0xf0]  ;;  %v1293_v1 = vld [vmem:[#allocation8 + $0x10] sm:$0xf]  ;;  %v1441_v2 = vld [vmem:[#allocation8 + $0x14] sm:$0xf0] }
  0x58   : > { %495 = vmatpush.bf16.msra.mxu0 %v1230_v40  ;;  %1478 = vmatpush.bf16.msra.mxu2 %v1230_v40  ;;  %v1382_v40 = vor.u32 %v1463_v34, %v1381_v33  ;;  %v346_v59 = vld [vmem:[%s1964_s26 + $0x30] sm:$0xf]  ;;  %v1302_v60 = vor.u32 %v1443_v54, %v1301_v53  ;;  %v1440_v6 = vld [vmem:[#allocation8 + $0x14] sm:$0xf]  ;;  %v1285_v13 = vld [vmem:[#allocation8] sm:$0xf] }
  0x59   : > { %538 = vmatpush.bf16.msra.mxu1 %v1234_v41  ;;  %1486 = vmatpush.bf16.msra.mxu3 %v1234_v41  ;;  %v1309_v41 = vld [vmem:[#allocation8 + $0x30] sm:$0xf]  ;;  %v1457_v5 = vld [vmem:[#allocation8 + $0x94] sm:$0xf0]  ;;  %v1295_v7 = vld [vmem:[#allocation8 + $0x18] sm:$0xf0] }
  0x5a   : > { %v1310_v51 = vor.u32 %v1445_v42, %v1309_v41  ;;  %v1298_v9 = vor.u32 %v1440_v6, %v1295_v7  ;;  %v1456_v10 = vld [vmem:[#allocation8 + $0x94] sm:$0xf]  ;;  %v1439_v14 = vld [vmem:[#allocation8 + $0x4] sm:$0xf0]  ;;  %v1438_v18 = vld [vmem:[#allocation8 + $0x4] sm:$0xf] }
  0x5b   : > { %v1455_v17 = vld [vmem:[#allocation8 + $0x84] sm:$0xf0]  ;;  %v1290_v21 = vor.u32 %v1438_v18, %v1287_v19  ;;  %v1454_v22 = vld [vmem:[#allocation8 + $0x84] sm:$0xf]  ;;  %v1351_v23 = vld [vmem:[#allocation8 + $0x88] sm:$0xf0] }
  0x5c   : > { %496 = vmatpush.bf16.msra.mxu0 %v1222_v46  ;;  %1479 = vmatpush.bf16.msra.mxu2 %v1222_v46  ;;  %v1461_v46 = vld [vmem:[#allocation8 + $0xb4] sm:$0xf0]  ;;  %v1354_v24 = vor.u32 %v1454_v22, %v1351_v23  ;;  %s2029_s29 = scalar_lea.vmem [#allocation10], %s1490_s16  ;;  %s1046_s11 = sshll.u32 %s2024_s20, 4  ;;  %s1047_s11 = int_to_ptr.vmem [resolvable:$true] %s1046_s11 }
  0x5d   : > { %539 = vmatpush.bf16.msra.mxu1 %v1226_v47  ;;  %1487 = vmatpush.bf16.msra.mxu3 %v1226_v47  ;;  %v1442_v47 = vld [vmem:[#allocation8 + $0x24] sm:$0xf]  ;;  %v1374_v52 = vor.u32 %v1461_v46, %v1373_v45  ;;  %s1048_s19 = sshll.u32 %s1045_s17, 4  ;;  %s1029_s1 = sshll.u32 %s2029_s29, 4  ;;  %s1049_s19 = int_to_ptr.hbm [resolvable:$true] %s1048_s19  ;;  %s1030_s1 = int_to_ptr.vmem [resolvable:$true] %s1029_s1 }
  0x5e   : > { %s1031_s2 = sshll.u32 %s2083_s18, 4  ;;  %s1713_s27 = sshra.s32 %s1049_s19, 4  ;;  %s1714_s27 = int_to_ptr.hbm [resolvable:$true] %s1713_s27  ;;  %s1032_s2 = int_to_ptr.hbm [resolvable:$true] %s1031_s2 }
  0x5f   : > { %497 = vmatmul.bf16.vlgmr.msra.gmra.mxu0 %v1416_v48  ;;  %517 = vmatmul.bf16.vlgmr.msra.gmra.mxu2 %v1420_v50  ;;  %s1715_s8 = scalar_lea.hbm %s1714_s27, 104  ;;  %p1720_p11 = scmp.lt.s32.totalorder %s1714_s27, %s2137_s6 }
  0x60   : > { %540 = vmatmul.bf16.vlgmr.msra.gmra.mxu1 %v1416_v48  ;;  %560 = vmatmul.bf16.vlgmr.msra.gmra.mxu3 %v1420_v50  ;;  %v1303_v48 = vld [vmem:[#allocation8 + $0x28] sm:$0xf0]  ;;  %p1716_p1 = scmp.ne.s32.totalorder %s1714_s27, %s1715_s8  ;;  %p1721_p9 = scmp.lt.s32.totalorder %s1719_s9, %s1715_s8 }
  0x61   : > { %899 = vmatpush.bf16.msrb.mxu0 %v1346_v55  ;;  %942 = vmatpush.bf16.msrb.mxu1 %v1410_v56  ;;  %v1367_v50 = vld [vmem:[#allocation8 + $0xa8] sm:$0xf0]  ;;  %v1365_v55 = vld [vmem:[#allocation8 + $0xa0] sm:$0xf]  ;;  %v1459_v56 = vld [vmem:[#allocation8 + $0xa4] sm:$0xf0]  ;;  %v1306_v57 = vor.u32 %v1442_v47, %v1303_v48 }
  0x62   : > { %813 = vmatpush.bf16.msrb.mxu2 %v1342_v3  ;;  %856 = vmatpush.bf16.msrb.mxu3 %v1406_v4  ;;  %v1366_v61 = vor.u32 %v1459_v56, %v1365_v55  ;;  %v1357_v3 = vld [vmem:[#allocation8 + $0x90] sm:$0xf]  ;;  %v1294_v4 = vor.u32 %v1441_v2, %v1293_v1  ;;  %p1717_p4 = pnand %p1716_p1, %p1934_p7  ;;  %p1722_p2 = por %p1721_p9, %p1720_p11 }
  0x63   : > { %v1358_v8 = vor.u32 %v1457_v5, %v1357_v3 }
  0x64   : > { %p1718_p8 = pneg %p1717_p4 }
  0x65   : > { %900 = vmatpush.bf16.msrb.mxu0 %v1338_v62  ;;  %943 = vmatpush.bf16.msrb.mxu1 %v1402_v63  ;;  %v394_v62 = vunpack.c.l.b16 %v346_v59  ;;  %v1419_v63 = vld [vmem:[%s1964_s26 + $0x18] sm:$0xff]  ;;  %s1017_s26 = scalar_lea.sflag [#allocation12], %s1960_s15 }
  0x66   : > { %814 = vmatpush.bf16.msrb.mxu2 %v1334_v11  ;;  %857 = vmatpush.bf16.msrb.mxu3 %v1398_v12  ;;  %v1359_v11 = vld [vmem:[#allocation8 + $0x98] sm:$0xf0]  ;;  %p1723_p10 = pnand %p1722_p2, %p1718_p8 }
  0x67   : > { %v401_v0 = vpack.c.b16 %v394_v62, %v394_v62  ;;  %v1362_v12 = vor.u32 %v1456_v10, %v1359_v11 }
  0x69   : > { %901 = vmatpush.bf16.msrb.mxu0 %v1330_v15  ;;  %944 = vmatpush.bf16.msrb.mxu1 %v1394_v16  ;;  %v1349_v15 = vld [vmem:[#allocation8 + $0x80] sm:$0xf]  ;;  %v1286_v16 = vor.u32 %v1439_v14, %v1285_v13 }
  0x6a   : > { %815 = vmatpush.bf16.msrb.mxu2 %v1326_v26  ;;  %858 = vmatpush.bf16.msrb.mxu3 %v1390_v28  ;;  %v1350_v20 = vor.u32 %v1455_v17, %v1349_v15 }
  0x6d   : > { %902 = vmatpush.bf16.msrb.mxu0 %v1322_v31  ;;  %945 = vmatpush.bf16.msrb.mxu1 %v1386_v32 }
  0x6e   : > { %816 = vmatpush.bf16.msrb.mxu2 %v1318_v39  ;;  %859 = vmatpush.bf16.msrb.mxu3 %v1382_v40 }
  0x6f   : > { %502 = vmatmul.bf16.gmra.mxu0 %v1417_v49  ;;  %522 = vmatmul.bf16.gmra.mxu2 %v1421_v27 }
  0x70   : > { %545 = vmatmul.bf16.gmra.mxu1 %v1417_v49  ;;  %565 = vmatmul.bf16.gmra.mxu3 %v1421_v27  ;;  %v1458_v49 = vld [vmem:[#allocation8 + $0xa4] sm:$0xf] }
  0x71   : > { %903 = vmatpush.bf16.msrb.mxu0 %v1314_v43  ;;  %946 = vmatpush.bf16.msrb.mxu1 %v1378_v44  ;;  %v1370_v58 = vor.u32 %v1458_v49, %v1367_v50 }
  0x72   : > { %817 = vmatpush.bf16.msrb.mxu2 %v1310_v51  ;;  %860 = vmatpush.bf16.msrb.mxu3 %v1374_v52 }
  0x75   : > { %904 = vmatpush.bf16.msrb.mxu0 %v1306_v57  ;;  %947 = vmatpush.bf16.msrb.mxu1 %v1370_v58 }
  0x76   : > { %818 = vmatpush.bf16.msrb.mxu2 %v1302_v60  ;;  %861 = vmatpush.bf16.msrb.mxu3 %v1366_v61 }
  0x79   : > { %905 = vmatpush.bf16.msrb.mxu0 %v1298_v9  ;;  %948 = vmatpush.bf16.msrb.mxu1 %v1362_v12 }
  0x7a   : > { %819 = vmatpush.bf16.msrb.mxu2 %v1294_v4  ;;  %862 = vmatpush.bf16.msrb.mxu3 %v1358_v8 }
  0x7d   : > { %906 = vmatpush.bf16.msrb.mxu0 %v1290_v21  ;;  %949 = vmatpush.bf16.msrb.mxu1 %v1354_v24 }
  0x7e   : > { %820 = vmatpush.bf16.msrb.mxu2 %v1286_v16  ;;  %863 = vmatpush.bf16.msrb.mxu3 %v1350_v20 }
  0x7f   : > { %507 = vmatmul.bf16.gmra.mxu0 %v1418_v25  ;;  %527 = vmatmul.bf16.gmra.mxu2 %v401_v0 }
  0x80   : > { %550 = vmatmul.bf16.gmra.mxu1 %v1418_v25  ;;  %570 = vmatmul.bf16.gmra.mxu3 %v401_v0  ;;  %v363_v25 = vld [vmem:[#allocation7] sm:$0x3] }
  0x81   : > { %v1985_v28 = vperm.slane %v363_v25, 0  ;;  %v1987_v29 = vperm.slane %v363_v25, 1 }
  0x8f   : > { %512 = vmatmul.bf16.gmra.mxu0 %v1419_v63 }
  0x90   : > { %555 = vmatmul.bf16.gmra.mxu1 %v1419_v63 }
  0xdc   : > { %v498_v26 = vpop.f32.mrf.mxu0 }
  0xdd   : > { %v541_v27 = vpop.f32.mrf.mxu1  ;;  %v499_v30 = vadd.f32 %v498_v26, %v1985_v28 }
  0xde   : > { %v542_v31 = vadd.f32 %v541_v27, %v1987_v29 }
  0xdf   : > { %v575_v36 = vmax.f32 %v499_v30, 0.0 }
  0xe0   : > { %v576_v38 = vmax.f32 %v542_v31, 0.0 }
  0xe2   : > { %v518_v49 = vpop.f32.mrf.mxu2 }
  0xe3   : > { %v561_v51 = vpop.f32.mrf.mxu3 }
  0xe4   : > { %v500_v32 = vpop.f32.mrf.mxu0 }
  0xe5   : > { %v501_v33 = vadd.f32 %v500_v32, %v1985_v28  ;;  %v543_v34 = vpop.f32.mrf.mxu1  ;;  %v519_v32 = vadd.f32 %v518_v49, %v1985_v28 }
  0xe6   : > { %v544_v35 = vadd.f32 %v543_v34, %v1987_v29  ;;  %v562_v34 = vadd.f32 %v561_v51, %v1987_v29 }
  0xe7   : > { %v577_v37 = vmax.f32 %v501_v33, 0.0 }
  0xe8   : > { %v578_v39 = vmax.f32 %v544_v35, 0.0 }
  0xe9   : > { %v601_v40 = vpack.c.bf16 %v577_v37, %v575_v36 }
  0xea   : > { %v602_v41 = vpack.c.bf16 %v578_v39, %v576_v38  ;;  %v520_v60 = vpop.f32.mrf.mxu2  ;;  %v591_v38 = vmax.f32 %v519_v32, 0.0 }
  0xeb   : > { %821 = vmatmul.bf16.vlgmr.msrb.gmra.mxu2 %v601_v40  ;;  %907 = vmatmul.bf16.vlgmr.msrb.gmra.mxu0 %v601_v40  ;;  %v563_v61 = vpop.f32.mrf.mxu3  ;;  %v521_v33 = vadd.f32 %v520_v60, %v1985_v28  ;;  %v592_v40 = vmax.f32 %v562_v34, 0.0  ;;  %v647_v60 = vld [vmem:[%s2135_s4] sm:$0x3] }
  0xec   : > { %864 = vmatmul.bf16.vlgmr.msrb.gmra.mxu3 %v602_v41  ;;  %950 = vmatmul.bf16.vlgmr.msrb.gmra.mxu1 %v602_v41  ;;  %v503_v42 = vpop.f32.mrf.mxu0  ;;  %v564_v35 = vadd.f32 %v563_v61, %v1987_v29  ;;  %v2018_v61 = vperm.slane %v647_v60, 1 }
  0xed   : > { %v546_v43 = vpop.f32.mrf.mxu1  ;;  %v504_v44 = vadd.f32 %v503_v42, %v1985_v28  ;;  %v593_v39 = vmax.f32 %v521_v33, 0.0 }
  0xee   : > { %v547_v45 = vadd.f32 %v546_v43, %v1987_v29  ;;  %v594_v41 = vmax.f32 %v564_v35, 0.0 }
  0xef   : > { %v579_v52 = vmax.f32 %v504_v44, 0.0  ;;  %v609_v42 = vpack.c.bf16 %v593_v39, %v591_v38 }
  0xf0   : > { %v580_v54 = vmax.f32 %v547_v45, 0.0  ;;  %v610_v43 = vpack.c.bf16 %v594_v41, %v592_v40 }
  0xf2   : > { %v523_v9 = vpop.f32.mrf.mxu2 }
  0xf3   : > { %v566_v11 = vpop.f32.mrf.mxu3  ;;  %v524_v44 = vadd.f32 %v523_v9, %v1985_v28 }
  0xf4   : > { %v505_v46 = vpop.f32.mrf.mxu0 }
  0xf5   : > { %v506_v47 = vadd.f32 %v505_v46, %v1985_v28  ;;  %v548_v48 = vpop.f32.mrf.mxu1  ;;  %v567_v46 = vadd.f32 %v566_v11, %v1987_v29 }
  0xf6   : > { %v549_v50 = vadd.f32 %v548_v48, %v1987_v29  ;;  %v595_v48 = vmax.f32 %v524_v44, 0.0 }
  0xf7   : > { %v581_v53 = vmax.f32 %v506_v47, 0.0 }
  0xf8   : > { %v582_v55 = vmax.f32 %v549_v50, 0.0  ;;  %v596_v50 = vmax.f32 %v567_v46, 0.0 }
  0xf9   : > { %v603_v56 = vpack.c.bf16 %v581_v53, %v579_v52 }
  0xfa   : > { %v604_v57 = vpack.c.bf16 %v582_v55, %v580_v54  ;;  %v525_v15 = vpop.f32.mrf.mxu2 }
  0xfb   : > { %826 = vmatmul.bf16.gmra.mxu2 %v603_v56  ;;  %912 = vmatmul.bf16.gmra.mxu0 %v603_v56  ;;  %v568_v18 = vpop.f32.mrf.mxu3  ;;  %v526_v45 = vadd.f32 %v525_v15, %v1985_v28 }
  0xfc   : > { %869 = vmatmul.bf16.gmra.mxu3 %v604_v57  ;;  %955 = vmatmul.bf16.gmra.mxu1 %v604_v57  ;;  %v508_v58 = vpop.f32.mrf.mxu0  ;;  %v569_v47 = vadd.f32 %v568_v18, %v1987_v29 }
  0xfd   : > { %v551_v59 = vpop.f32.mrf.mxu1  ;;  %v509_v62 = vadd.f32 %v508_v58, %v1985_v28  ;;  %v597_v49 = vmax.f32 %v526_v45, 0.0 }
  0xfe   : > { %v552_v63 = vadd.f32 %v551_v59, %v1987_v29  ;;  %v598_v51 = vmax.f32 %v569_v47, 0.0 }
  0xff   : > { %v583_v4 = vmax.f32 %v509_v62, 0.0  ;;  %v611_v52 = vpack.c.bf16 %v597_v49, %v595_v48 }
 0x100   : > { %v584_v6 = vmax.f32 %v552_v63, 0.0  ;;  %v612_v53 = vpack.c.bf16 %v598_v51, %v596_v50 }
 0x102   : > { %v528_v30 = vpop.f32.mrf.mxu2 }
 0x103   : > { %v571_v31 = vpop.f32.mrf.mxu3  ;;  %v529_v54 = vadd.f32 %v528_v30, %v1985_v28 }
 0x104   : > { %v510_v0 = vpop.f32.mrf.mxu0  ;;  %v572_v55 = vadd.f32 %v571_v31, %v1987_v29 }
 0x105   : > { %v511_v1 = vadd.f32 %v510_v0, %v1985_v28  ;;  %v553_v2 = vpop.f32.mrf.mxu1  ;;  %v599_v56 = vmax.f32 %v529_v54, 0.0  ;;  %v2022_v0 = vperm.slane %v647_v60, 0 }
 0x106   : > { %v554_v3 = vadd.f32 %v553_v2, %v1987_v29  ;;  %v600_v57 = vmax.f32 %v572_v55, 0.0 }
 0x107   : > { %v585_v5 = vmax.f32 %v511_v1, 0.0  ;;  %v613_v58 = vpack.c.bf16 %v599_v56, %v599_v56 }
 0x108   : > { %v586_v7 = vmax.f32 %v554_v3, 0.0  ;;  %v614_v59 = vpack.c.bf16 %v600_v57, %v600_v57 }
 0x109   : > { %v605_v8 = vpack.c.bf16 %v585_v5, %v583_v4 }
 0x10a   : > { %v606_v10 = vpack.c.bf16 %v586_v7, %v584_v6  ;;  %v530_v36 = vpop.f32.mrf.mxu2 }
 0x10b   : > { %831 = vmatmul.bf16.gmra.mxu2 %v605_v8  ;;  %917 = vmatmul.bf16.gmra.mxu0 %v605_v8  ;;  %v573_v37 = vpop.f32.mrf.mxu3 }
 0x10c   : > { %874 = vmatmul.bf16.gmra.mxu3 %v606_v10  ;;  %960 = vmatmul.bf16.gmra.mxu1 %v606_v10  ;;  %v513_v12 = vpop.f32.mrf.mxu0 }
 0x10d   : > { %v556_v13 = vpop.f32.mrf.mxu1  ;;  %v514_v14 = vadd.f32 %v513_v12, %v1985_v28 }
 0x10e   : > { %v557_v16 = vadd.f32 %v556_v13, %v1987_v29 }
 0x10f   : > { %v587_v22 = vmax.f32 %v514_v14, 0.0 }
 0x110   : > { %v588_v24 = vmax.f32 %v557_v16, 0.0 }
 0x114   : > { %v515_v17 = vpop.f32.mrf.mxu0 }
 0x115   : > { %v516_v19 = vadd.f32 %v515_v17, %v1985_v28  ;;  %v558_v20 = vpop.f32.mrf.mxu1 }
 0x116   : > { %v559_v21 = vadd.f32 %v558_v20, %v1987_v29 }
 0x117   : > { %v589_v23 = vmax.f32 %v516_v19, 0.0 }
 0x118   : > { %v590_v25 = vmax.f32 %v559_v21, 0.0 }
 0x119   : > { %v607_v26 = vpack.c.bf16 %v589_v23, %v587_v22 }
 0x11a   : > { %v608_v27 = vpack.c.bf16 %v590_v25, %v588_v24 }
 0x11b   : > { %836 = vmatmul.bf16.gmra.mxu2 %v607_v26  ;;  %922 = vmatmul.bf16.gmra.mxu0 %v607_v26 }
 0x11c   : > { %879 = vmatmul.bf16.gmra.mxu3 %v608_v27  ;;  %965 = vmatmul.bf16.gmra.mxu1 %v608_v27 }
 0x12b   : > { %841 = vmatmul.bf16.gmra.mxu2 %v609_v42  ;;  %927 = vmatmul.bf16.gmra.mxu0 %v609_v42 }
 0x12c   : > { %884 = vmatmul.bf16.gmra.mxu3 %v610_v43  ;;  %970 = vmatmul.bf16.gmra.mxu1 %v610_v43 }
 0x13b   : > { %846 = vmatmul.bf16.gmra.mxu2 %v611_v52  ;;  %932 = vmatmul.bf16.gmra.mxu0 %v611_v52 }
 0x13c   : > { %889 = vmatmul.bf16.gmra.mxu3 %v612_v53  ;;  %975 = vmatmul.bf16.gmra.mxu1 %v612_v53 }
 0x14b   : > { %851 = vmatmul.bf16.gmra.mxu2 %v613_v58  ;;  %937 = vmatmul.bf16.gmra.mxu0 %v613_v58 }
 0x14c   : > { %894 = vmatmul.bf16.gmra.mxu3 %v614_v59  ;;  %980 = vmatmul.bf16.gmra.mxu1 %v614_v59 }
 0x168   : > { %v908_v62 = vpop.f32.mrf.mxu0 }
 0x169   : > { %v909_v28 = vadd.f32 %v908_v62, %v2018_v61  ;;  %v951_v63 = vpop.f32.mrf.mxu1 }
 0x16b   : > { %v952_v29 = vadd.f32 %v951_v63, %v909_v28 }
 0x16d   : > { %998 = vst [vmem:[%s2024_s20] sm:$0xff] %v952_v29 }
 0x16e   : > { %v822_v1 = vpop.f32.mrf.mxu2 }
 0x16f   : > { %v823_v2 = vadd.f32 %v822_v1, %v2022_v0  ;;  %v865_v3 = vpop.f32.mrf.mxu3 }
 0x170   : > { %v910_v4 = vpop.f32.mrf.mxu0 }
 0x171   : > { %v866_v5 = vadd.f32 %v865_v3, %v823_v2  ;;  %v911_v6 = vadd.f32 %v910_v4, %v2018_v61  ;;  %v953_v7 = vpop.f32.mrf.mxu1 }
 0x173   : > { %985 = vst [vmem:[%s2029_s29] sm:$0xff] %v866_v5  ;;  %v954_v8 = vadd.f32 %v953_v7, %v911_v6 }
 0x175   : > { %999 = vst [vmem:[%s2024_s20 + $0x8] sm:$0xff] %v954_v8 }
 0x176   : > { %v824_v9 = vpop.f32.mrf.mxu2 }
 0x177   : > { %v825_v10 = vadd.f32 %v824_v9, %v2022_v0  ;;  %v867_v11 = vpop.f32.mrf.mxu3 }
 0x178   : > { %v913_v12 = vpop.f32.mrf.mxu0 }
 0x179   : > { %v868_v13 = vadd.f32 %v867_v11, %v825_v10  ;;  %v914_v14 = vadd.f32 %v913_v12, %v2018_v61  ;;  %v956_v15 = vpop.f32.mrf.mxu1 }
 0x17b   : > { %986 = vst [vmem:[%s2029_s29 + $0x8] sm:$0xff] %v868_v13  ;;  %v957_v16 = vadd.f32 %v956_v15, %v914_v14 }
 0x17d   : > { %1000 = vst [vmem:[%s2024_s20 + $0x10] sm:$0xff] %v957_v16 }
 0x17e   : > { %v827_v17 = vpop.f32.mrf.mxu2 }
 0x17f   : > { %v828_v18 = vadd.f32 %v827_v17, %v2022_v0  ;;  %v870_v19 = vpop.f32.mrf.mxu3 }
 0x180   : > { %v915_v20 = vpop.f32.mrf.mxu0 }
 0x181   : > { %v871_v21 = vadd.f32 %v870_v19, %v828_v18  ;;  %v916_v22 = vadd.f32 %v915_v20, %v2018_v61  ;;  %v958_v23 = vpop.f32.mrf.mxu1 }
 0x183   : > { %987 = vst [vmem:[%s2029_s29 + $0x10] sm:$0xff] %v871_v21  ;;  %v959_v24 = vadd.f32 %v958_v23, %v916_v22 }
 0x185   : > { %1001 = vst [vmem:[%s2024_s20 + $0x18] sm:$0xff] %v959_v24 }
 0x186   : > { %v829_v25 = vpop.f32.mrf.mxu2 }
 0x187   : > { %v830_v26 = vadd.f32 %v829_v25, %v2022_v0  ;;  %v872_v27 = vpop.f32.mrf.mxu3 }
 0x188   : > { %v918_v30 = vpop.f32.mrf.mxu0 }
 0x189   : > { %v873_v31 = vadd.f32 %v872_v27, %v830_v26  ;;  %v919_v32 = vadd.f32 %v918_v30, %v2018_v61  ;;  %v961_v33 = vpop.f32.mrf.mxu1 }
 0x18b   : > { %988 = vst [vmem:[%s2029_s29 + $0x18] sm:$0xff] %v873_v31  ;;  %v962_v34 = vadd.f32 %v961_v33, %v919_v32 }
 0x18d   : > { %1002 = vst [vmem:[%s2024_s20 + $0x20] sm:$0xff] %v962_v34 }
 0x18e   : > { %v832_v35 = vpop.f32.mrf.mxu2 }
 0x18f   : > { %v833_v36 = vadd.f32 %v832_v35, %v2022_v0  ;;  %v875_v37 = vpop.f32.mrf.mxu3 }
 0x190   : > { %v920_v38 = vpop.f32.mrf.mxu0 }
 0x191   : > { %v876_v39 = vadd.f32 %v875_v37, %v833_v36  ;;  %v921_v40 = vadd.f32 %v920_v38, %v2018_v61  ;;  %v963_v41 = vpop.f32.mrf.mxu1 }
 0x193   : > { %989 = vst [vmem:[%s2029_s29 + $0x20] sm:$0xff] %v876_v39  ;;  %v964_v42 = vadd.f32 %v963_v41, %v921_v40 }
 0x195   : > { %1003 = vst [vmem:[%s2024_s20 + $0x28] sm:$0xff] %v964_v42 }
 0x196   : > { %v834_v43 = vpop.f32.mrf.mxu2 }
 0x197   : > { %v835_v44 = vadd.f32 %v834_v43, %v2022_v0  ;;  %v877_v45 = vpop.f32.mrf.mxu3 }
 0x198   : > { %v923_v46 = vpop.f32.mrf.mxu0 }
 0x199   : > { %v878_v47 = vadd.f32 %v877_v45, %v835_v44  ;;  %v924_v48 = vadd.f32 %v923_v46, %v2018_v61  ;;  %v966_v49 = vpop.f32.mrf.mxu1 }
 0x19b   : > { %990 = vst [vmem:[%s2029_s29 + $0x28] sm:$0xff] %v878_v47  ;;  %v967_v50 = vadd.f32 %v966_v49, %v924_v48 }
 0x19d   : > { %1004 = vst [vmem:[%s2024_s20 + $0x30] sm:$0xff] %v967_v50 }
 0x19e   : > { %v837_v51 = vpop.f32.mrf.mxu2 }
 0x19f   : > { %v838_v52 = vadd.f32 %v837_v51, %v2022_v0  ;;  %v880_v53 = vpop.f32.mrf.mxu3 }
 0x1a0   : > { %v925_v54 = vpop.f32.mrf.mxu0 }
 0x1a1   : > { %v881_v55 = vadd.f32 %v880_v53, %v838_v52  ;;  %v926_v56 = vadd.f32 %v925_v54, %v2018_v61  ;;  %v968_v57 = vpop.f32.mrf.mxu1 }
 0x1a3   : > { %991 = vst [vmem:[%s2029_s29 + $0x30] sm:$0xff] %v881_v55  ;;  %v969_v58 = vadd.f32 %v968_v57, %v926_v56 }
 0x1a5   : > { %1005 = vst [vmem:[%s2024_s20 + $0x38] sm:$0xff] %v969_v58 }
 0x1a6   : > { %v839_v59 = vpop.f32.mrf.mxu2 }
 0x1a7   : > { %v840_v60 = vadd.f32 %v839_v59, %v2022_v0  ;;  %v882_v62 = vpop.f32.mrf.mxu3 }
 0x1a8   : > { %v928_v28 = vpop.f32.mrf.mxu0 }
 0x1a9   : > { %v883_v63 = vadd.f32 %v882_v62, %v840_v60  ;;  %v929_v29 = vadd.f32 %v928_v28, %v2018_v61  ;;  %v971_v1 = vpop.f32.mrf.mxu1 }
 0x1ab   : > { %992 = vst [vmem:[%s2029_s29 + $0x38] sm:$0xff] %v883_v63  ;;  %v972_v2 = vadd.f32 %v971_v1, %v929_v29 }
 0x1ad   : > { %1006 = vst [vmem:[%s2024_s20 + $0x40] sm:$0xff] %v972_v2 }
 0x1ae   : > { %v842_v3 = vpop.f32.mrf.mxu2 }
 0x1af   : > { %v843_v4 = vadd.f32 %v842_v3, %v2022_v0  ;;  %v885_v5 = vpop.f32.mrf.mxu3 }
 0x1b0   : > { %v930_v6 = vpop.f32.mrf.mxu0 }
 0x1b1   : > { %v886_v7 = vadd.f32 %v885_v5, %v843_v4  ;;  %v931_v8 = vadd.f32 %v930_v6, %v2018_v61  ;;  %v973_v9 = vpop.f32.mrf.mxu1 }
 0x1b3   : > { %993 = vst [vmem:[%s2029_s29 + $0x40] sm:$0xff] %v886_v7  ;;  %v974_v10 = vadd.f32 %v973_v9, %v931_v8 }
 0x1b5   : > { %1007 = vst [vmem:[%s2024_s20 + $0x48] sm:$0xff] %v974_v10 }
 0x1b6   : > { %v844_v11 = vpop.f32.mrf.mxu2 }
 0x1b7   : > { %v845_v12 = vadd.f32 %v844_v11, %v2022_v0  ;;  %v887_v13 = vpop.f32.mrf.mxu3 }
 0x1b8   : > { %v933_v14 = vpop.f32.mrf.mxu0 }
 0x1b9   : > { %v888_v15 = vadd.f32 %v887_v13, %v845_v12  ;;  %v934_v16 = vadd.f32 %v933_v14, %v2018_v61  ;;  %v976_v17 = vpop.f32.mrf.mxu1 }
 0x1bb   : > { %994 = vst [vmem:[%s2029_s29 + $0x48] sm:$0xff] %v888_v15  ;;  %v977_v18 = vadd.f32 %v976_v17, %v934_v16 }
 0x1bd   : > { %1008 = vst [vmem:[%s2024_s20 + $0x50] sm:$0xff] %v977_v18 }
 0x1be   : > { %v847_v19 = vpop.f32.mrf.mxu2 }
 0x1bf   : > { %v848_v20 = vadd.f32 %v847_v19, %v2022_v0  ;;  %v890_v21 = vpop.f32.mrf.mxu3 }
 0x1c0   : > { %v935_v22 = vpop.f32.mrf.mxu0 }
 0x1c1   : > { %v891_v23 = vadd.f32 %v890_v21, %v848_v20  ;;  %v936_v24 = vadd.f32 %v935_v22, %v2018_v61  ;;  %v978_v25 = vpop.f32.mrf.mxu1 }
 0x1c3   : > { %995 = vst [vmem:[%s2029_s29 + $0x50] sm:$0xff] %v891_v23  ;;  %v979_v26 = vadd.f32 %v978_v25, %v936_v24 }
 0x1c5   : > { %1009 = vst [vmem:[%s2024_s20 + $0x58] sm:$0xff] %v979_v26 }
 0x1c6   : > { %v849_v27 = vpop.f32.mrf.mxu2 }
 0x1c7   : > { %v850_v30 = vadd.f32 %v849_v27, %v2022_v0  ;;  %v892_v31 = vpop.f32.mrf.mxu3 }
 0x1c8   : > { %v938_v32 = vpop.f32.mrf.mxu0 }
 0x1c9   : > { %v893_v33 = vadd.f32 %v892_v31, %v850_v30  ;;  %v939_v34 = vadd.f32 %v938_v32, %v2018_v61  ;;  %v981_v35 = vpop.f32.mrf.mxu1 }
 0x1cb   : > { %996 = vst [vmem:[%s2029_s29 + $0x58] sm:$0xff] %v893_v33  ;;  %v982_v36 = vadd.f32 %v981_v35, %v939_v34 }
 0x1cd   : > { %1010 = vst [vmem:[%s2024_s20 + $0x60] sm:$0xff] %v982_v36 }
 0x1ce   : > { %v852_v37 = vpop.f32.mrf.mxu2 }
 0x1cf   : > { %1726 = shalt.err (!%p1723_p10)
}
 0x1d0   : > { %s1814_s20 = smov 128   ;;  %s1815_s25 = smov 8   ;;  %v853_v61 = vadd.f32 %v852_v37, %v2022_v0  ;;  %v895_v38 = vpop.f32.mrf.mxu3  ;;  %v940_v39 = vpop.f32.mrf.mxu0 }
 0x1d1   : > { %1506 = dma.vmem_to_hbm [thread:$0]  (%p1934_p7), %s1047_s11, 1664, %s1049_s19, %s1017_s26, %s1814_s20, %s1814_s20, %s1815_s25   ;;  %v983_v41 = vpop.f32.mrf.mxu1 }
 0x1d2   : > { %v896_v40 = vadd.f32 %v895_v38, %v853_v61  ;;  %s1012_s14 = scalar_lea.sflag [#allocation4], %s1960_s15  ;;  %s1741_s18 = sshra.s32 %s1032_s2, 4  ;;  %s1742_s18 = int_to_ptr.hbm [resolvable:$true] %s1741_s18 }
 0x1d3   : > { %s1743_s27 = scalar_lea.hbm %s1742_s18, 104  ;;  %s1747_s11 = scalar_lea.hbm %s2136_s5, 208 }
 0x1d4   : > { %997 = vst [vmem:[%s2029_s29 + $0x60] sm:$0xff] %v896_v40  ;;  %p1744_p12 = scmp.ne.s32.totalorder %s1742_s18, %s1743_s27  ;;  %p1748_p3 = scmp.lt.s32.totalorder %s1742_s18, %s2136_s5 }
 0x1d5   : > { %p1749_p5 = scmp.lt.s32.totalorder %s1747_s11, %s1743_s27 }
 0x1d6   : > { %p1745_p13 = pnand %p1744_p12, %p1934_p7 }
 0x1d7   : > { %p1750_p1 = por %p1749_p5, %p1748_p3 }
 0x1d8   : > { %p1746_p0 = pneg %p1745_p13 }
 0x1da   : > { %p1751_p4 = pnand %p1750_p1, %p1746_p0 }
 0x1dc   : > { %1754 = shalt.err (!%p1751_p4)
}
 0x1dd   : > { %1505 = dma.vmem_to_hbm [thread:$0]  (%p1934_p7), %s1030_s1, 1664, %s1032_s2, %s1012_s14, %s1814_s20, %s1814_s20, %s1815_s25   ;;  %v854_v0 = vpop.f32.mrf.mxu2  ;;  %v897_v42 = vpop.f32.mrf.mxu3 }
 0x1de PF: > { %s1063_s15 = sand.u32 1, %s1793_s21   ;;  %p2148_p8 = scmp.ge.s32.totalorder %s1805_s24, 2 }
 0x1df   : > { %s1064_s29 = scalar_lea.sflag [#allocation4], %s1063_s15 }
 0x1e0   : > { %p1524_p11 = pnand %p2148_p8, %p1886_p6 }
 0x1e2   : > { %p1525_p9 = pneg %p1524_p11 }
 0x1e4   : > { %1784 = dma.done.wait (%p1525_p9), %s1064_s29, 1664  }
 0x1e5   : > { %1786 = vsyncadd (%p1525_p9), %s1064_s29, 4294965632  ;;  %s1074_s30 = scalar_lea.sflag [#allocation12], %s1063_s15 }
 0x1e6   : > { %1788 = dma.done.wait (%p1525_p9), %s1074_s30, 1664  }
 0x1e7   : > { %1790 = vsyncadd (%p1525_p9), %s1074_s30, 4294965632  ;;  %p25_p7 = scmp.ge.s32.totalorder %s1918_s7, 4   ;;  %s2149_s21 = smov %s1797_s22 }
 0x1e8   : > { %s2150_s22 = smov %s1801_s23  ;;  %s2151_s23 = smov %s1930_s12 }
 0x1e9   : > { %s2152_s24 = smov %s1918_s7  ;;  %27 = sbr.rel (!%p25_p7) target bundleno = 12 (0xc), region = 114 }
 0x1ee   :  { %1080 = vsyncpa [#allocation3], 1 }
 0x1ef   :  { %1082 = vsyncpa [#allocation3 + $0x1], 1 }
 0x1f0   :  { %1083 = vsyncpa [#allocation6], 1 }
 0x1f1   :  { %1084 = vsyncpa [#allocation9], 1 }
 0x1f2   :  { %1085 = vsyncpa [#allocation4], 1 }
 0x1f3   :  { %1087 = vsyncpa [#allocation4 + $0x1], 1 }
 0x1f4   :  { %1088 = vsyncpa [#allocation12], 1 }
 0x1f5   :  { %1090 = vsyncpa [#allocation12 + $0x1], 1 }

</bundles_post_ra>
